<compile_context>
chip_gen: v7x
topology: tpu7x:2x2x1
jax: 0.10.0
libtpu: 0.0.40
codegen_flags: <defaults>
</compile_context>

<pallas_src>
import jax
import jax.numpy as jnp
from jax.experimental import pallas as pl
from jax.experimental.pallas import tpu as pltpu

B = 2          # batch
D = 32         # head_dim == hidden
NQ = 8         # n_queries
NK = 4         # n_keys
NV = 4         # n_values
INV_SCALE = 1.0 / (D ** 0.5)   # unused under the collapse (softmax is uniform)


def fused_attn_kernel(x_ref, wt_ref, bt_ref, o_ref):
    # x_ref:  (B, D)        input rows
    # wt_ref: (D, NQ*D)     fused weight  Wv @ Wout, tiled NQ times along lanes
    # bt_ref: (1, NQ*D)     fused bias    bv @ Wout + bout, tiled NQ times
    # o_ref:  (B, NQ*D)     lane-dense (256 = 2x128 lanes) output
    #
    # One MXU push + one broadcast add + one unmasked lane-dense store.
    o_ref[...] = (
        jnp.dot(x_ref[...], wt_ref[...], preferred_element_type=jnp.float32)
        + bt_ref[...]
    ).astype(o_ref.dtype)


def prepare_fused_params(wqkv, bqkv, wout, bout):
    # Done ONCE (outside the per-call jit): only the V projection survives the
    # attention collapse; tile it along lanes so the kernel output is lane-dense.
    wv = wqkv[:, 2 * D:3 * D]                       # (D, D)
    bv = bqkv[2 * D:3 * D]                          # (D,)
    w_fused = wv @ wout                             # (D, D)
    b_fused = bv @ wout + bout                      # (D,)
    w_tiled = jnp.tile(w_fused, (1, NQ))            # (D, NQ*D) = (32, 256)
    b_tiled = jnp.tile(b_fused, (NQ,)).reshape(1, NQ * D)   # (1, 256)
    return w_tiled, b_tiled


@jax.jit
def model_forward(x1, x2, w_tiled, b_tiled):
    # x2 is accepted to mirror the PyTorch forward(x1, x2) signature; unused.
    del x2
    vmem = pl.BlockSpec(memory_space=pltpu.MemorySpace.VMEM)
    out_wide = pl.pallas_call(
        fused_attn_kernel,
        out_shape=jax.ShapeDtypeStruct((B, NQ * D), jnp.float32),
        in_specs=[vmem, vmem, vmem],
        out_specs=vmem,
    )(x1, w_tiled, b_tiled)
    # Row b holds NQ concatenated copies of y_b; row-major reshape (free)
    # recovers the module's (B*NQ, D) output layout.
    return out_wide.reshape(B * NQ, D)


def _reference(x1, wqkv, bqkv, wout, bout):
    # Long-way reference for the reinterpreted semantics (projection, repeat,
    # attention with softmax, weights @ v, flatten, out projection).
    qkv = x1 @ wqkv + bqkv
    q, k, v = qkv[:, :D], qkv[:, D:2 * D], qkv[:, 2 * D:]
    q_rep = jnp.broadcast_to(q[:, None, :], (B, NQ, D))
    k_rep = jnp.broadcast_to(k[:, None, :], (B, NK, D))
    v_rep = jnp.broadcast_to(v[:, None, :], (B, NV, D))
    att = jnp.einsum('bqd,bkd->bqk', q_rep, k_rep) * INV_SCALE
    w = jax.nn.softmax(att, axis=-1)
    o = jnp.einsum('bqk,bkd->bqd', w, v_rep).reshape(B * NQ, D)
    return o @ wout + bout


if __name__ == "__main__":
    key = jax.random.PRNGKey(0)
    kx, kw1, kb1, kw2, kb2 = jax.random.split(key, 5)

    x1 = jax.random.normal(kx, (B, D), dtype=jnp.float32)
    x2 = jnp.zeros((B, D), dtype=jnp.float32)   # unused, mirrors forward(x1, x2)

    # Deterministic parameter init (Linear(32, 96) and Linear(32, 32)),
    # stored as [in, out] and applied as x @ W.
    wqkv = jax.random.normal(kw1, (D, 3 * D), dtype=jnp.float32) * 0.1
    bqkv = jax.random.normal(kb1, (3 * D,), dtype=jnp.float32) * 0.1
    wout = jax.random.normal(kw2, (D, D), dtype=jnp.float32) * 0.1
    bout = jax.random.normal(kb2, (D,), dtype=jnp.float32) * 0.1

    # One-time weight fusion + lane tiling (static across calls).
    w_tiled, b_tiled = prepare_fused_params(wqkv, bqkv, wout, bout)

    out = model_forward(x1, x2, w_tiled, b_tiled)
    out = jax.block_until_ready(out)

    ref = _reference(x1, wqkv, bqkv, wout, bout)
    assert out.shape == (B * NQ, D)
    assert jnp.allclose(out, ref, atol=1e-4, rtol=1e-4)

    print("KERNEL_OK")
</pallas_src>

<mosaic_0001>
module attributes {stable_mosaic.version = 11 : i64} {
  func.func @fused_attn_kernel(%arg0: memref<2x32xf32, #tpu.memory_space<vmem>>, %arg1: memref<32x256xf32, #tpu.memory_space<vmem>>, %arg2: memref<1x256xf32, #tpu.memory_space<vmem>>, %arg3: memref<2x256xf32, #tpu.memory_space<vmem>>) attributes {dimension_semantics = [], scalar_prefetch = 0 : i64, scratch_operands = 0 : i64, tpu.core_type = #tpu.core_type<tc>} {
    %c0 = arith.constant 0 : index
    %c0_0 = arith.constant 0 : index
    %0 = vector.load %arg0[%c0, %c0_0] : memref<2x32xf32, #tpu.memory_space<vmem>>, vector<2x32xf32>
    %c0_1 = arith.constant 0 : index
    %c0_2 = arith.constant 0 : index
    %1 = vector.load %arg1[%c0_1, %c0_2] : memref<32x256xf32, #tpu.memory_space<vmem>>, vector<32x256xf32>
    %cst = arith.constant dense<0.000000e+00> : vector<2x256xf32>
    %2 = tpu.matmul %0, %1, %cst {dimension_numbers = #tpu.dot_dimension_numbers<[1], [0], [0], [1], [0, 0, 1, 1], [], []>} : vector<2x32xf32>, vector<32x256xf32>, vector<2x256xf32> -> vector<2x256xf32>
    %c0_3 = arith.constant 0 : index
    %c0_4 = arith.constant 0 : index
    %3 = vector.load %arg2[%c0_3, %c0_4] : memref<1x256xf32, #tpu.memory_space<vmem>>, vector<1x256xf32>
    %4 = vector.broadcast %3 : vector<1x256xf32> to vector<2x256xf32>
    %5 = arith.addf %2, %4 : vector<2x256xf32>
    %c0_5 = arith.constant 0 : index
    %c0_6 = arith.constant 0 : index
    %6 = vector.load %arg3[%c0_5, %c0_6] : memref<2x256xf32, #tpu.memory_space<vmem>>, vector<2x256xf32>
    tpu.vector_store %arg3[%c0_5, %c0_6], %5 {strides = array<i32>} : memref<2x256xf32, #tpu.memory_space<vmem>>, vector<2x256xf32>,
    return
  }
}

</mosaic_0001>

<bundles_post_ra>
// kernel: model_forward.1
= control target key start
LH: loop header
LB: loop body
LE: loop exit
PB: predicated region body
PF: predicated region fallthrough
CT: control target
= control target key end

     0   :  { %8 = vsyncpa [#allocation3], 0  ;;  %s279_s0 = inlined_call_operand.hbm [shape: f32[2,32], index: 0, kind: input, shape index: {}]   ;;  %s280_s1 = inlined_call_operand.hbm [shape: f32[32,256], index: 1, kind: input, shape index: {}]   ;;  %s281_s2 = inlined_call_operand.vmem [shape: f32[1,256], index: 2, kind: input, shape index: {}]   ;;  %s282_s3 = inlined_call_operand.vmem [shape: f32[2,256], index: 3, kind: output, shape index: {}]  }
   0x1   :  { %9 = vsyncpa [#allocation5], 0  ;;  %s217_s12 = smov [#allocation2]   ;;  %s218_s14 = smov [#allocation4]  }
   0x2   :  { %s16_s13 = sshll.u32 %s217_s12, 4  ;;  %s25_s15 = sshll.u32 %s218_s14, 4  ;;  %s17_s13 = int_to_ptr.vmem [resolvable:$true] %s16_s13  ;;  %s242_s15 = int_to_ptr.vmem [resolvable:$true] %s25_s15 }
   0x3   :  { %s169_s18 = scalar_lea.hbm %s279_s0, 32 }
   0x4   :  { %p170_p0 = scmp.ne.s32.totalorder %s279_s0, %s169_s18  ;;  %p173_p1 = scmp.lt.u32.totalorder %s169_s18, %s279_s0 }
   0x6   :  { %p175_p2 = pnand %p173_p1, %p170_p0 }
   0x8   :  { %178 = shalt.err (!%p175_p2)
}
   0x9   :  { %s179_s23 = scalar_lea.vmem %s17_s13, 32  ;;  %p184_p4 = scmp.lt.s32.totalorder %s17_s13, %s17_s13 }
   0xa   :  { %p180_p3 = scmp.ne.s32.totalorder %s17_s13, %s179_s23  ;;  %p185_p5 = scmp.lt.s32.totalorder %s179_s23, %s179_s23 }
   0xc   :  { %p186_p6 = por %p185_p5, %p184_p4 }
   0xe   :  { %p187_p7 = pnand %p186_p6, %p180_p3 }
  0x10   :  { %190 = shalt.err (!%p187_p7)
}
  0x11   :  { %19 = dma.hbm_to_vmem [thread:$0]  %s279_s0, 32, %s17_s13, [#allocation3]  }
  0x12   :  { %s191_s28 = scalar_lea.hbm %s280_s1, 1024 }
  0x13   :  { %p192_p8 = scmp.ne.s32.totalorder %s280_s1, %s191_s28  ;;  %p195_p9 = scmp.lt.u32.totalorder %s191_s28, %s280_s1 }
  0x15   :  { %p197_p10 = pnand %p195_p9, %p192_p8 }
  0x17   :  { %200 = shalt.err (!%p197_p10)
}
  0x18   :  { %s201_s6 = scalar_lea.vmem %s242_s15, 1024  ;;  %p206_p12 = scmp.lt.s32.totalorder %s242_s15, %s242_s15 }
  0x19   :  { %p202_p11 = scmp.ne.s32.totalorder %s242_s15, %s201_s6  ;;  %p207_p13 = scmp.lt.s32.totalorder %s201_s6, %s201_s6 }
  0x1b   :  { %p208_p0 = por %p207_p13, %p206_p12 }
  0x1d   :  { %p209_p1 = pnand %p208_p0, %p202_p11 }
  0x1f   :  { %212 = shalt.err (!%p209_p1)
}
  0x20   :  { %s219_s0 = smov 256   ;;  %s220_s7 = smov 16  }
  0x21   :  { %31 = dma.hbm_to_vmem [thread:$0]  %s280_s1, 1024, %s242_s15, [#allocation5], %s219_s0, %s219_s0, %s220_s7  }
  0x22   :  { %213 = dma.done.wait [#allocation3], 32  }
  0x23   :  { %214 = vsyncadd [#allocation3], 4294967264 }
  0x24   :  { %215 = dma.done.wait [#allocation5], 1024  }
  0x25   :  { %216 = vsyncadd [#allocation5], 4294966272  ;;  %v221_v0 = vmov 0.0   ;;  %v42_v1 = vld [vmem:[#allocation4 + $0x8] sm:$0xff]  ;;  %v44_v2 = vld [vmem:[#allocation4 + $0x18] sm:$0xff]  ;;  %vm61_vm0 = vcmask 261120   ;;  %v51_v14 = vlaneseq }
  0x26   :  { %129 = vmatprep.mubr.f32.mxu0 %v221_v0  ;;  %v41_v3 = vld [vmem:[#allocation4] sm:$0xff]  ;;  %v156_v4 = vpack.c.bf16 %v44_v2, %v42_v1  ;;  %v43_v5 = vld [vmem:[#allocation4 + $0x10] sm:$0xff]  ;;  %v46_v6 = vld [vmem:[#allocation4 + $0x28] sm:$0xff] }
  0x27   :  { %v48_v7 = vld [vmem:[#allocation4 + $0x38] sm:$0xff]  ;;  %v158_v8 = vpack.c.bf16 %v43_v5, %v41_v3  ;;  %v45_v10 = vld [vmem:[#allocation4 + $0x20] sm:$0xff]  ;;  %v47_v11 = vld [vmem:[#allocation4 + $0x30] sm:$0xff]  ;;  %v52_v15 = vshrl.u32 %v51_v14, 7 }
  0x28   :  { %v160_v9 = vpack.c.bf16 %v48_v7, %v46_v6  ;;  %157 = vmatprep.subr.bf16.mxu0 %v156_v4  ;;  %v162_v12 = vpack.c.bf16 %v47_v11, %v45_v10  ;;  %v40_v13 = vld [vmem:[#allocation2] sm:$0x3]  ;;  %v49_v17 = vld [vmem:[%s281_s2] sm:$0x3] }
  0x29   :  { %159 = vmatpush1.bf16.msra.mxu0 %v158_v8  ;;  %v53_v16 = vsub.s32 0, %v52_v15  ;;  %v57_v18 = vsub.s32 1, %v52_v15 }
  0x2a   :  { %161 = vmatprep.subr.bf16.mxu0 %v160_v9 }
  0x2b   :  { %v54_v19 = vrot.slane %v49_v17, %v53_v16  ;;  %v58_v20 = vrot.slane %v49_v17, %v57_v18 }
  0x2d   :  { %163 = vmatpush1.bf16.msra.mxu0 %v162_v12 }
  0x30   :  { %154 = vmatmul.mubr.msk.f32.vlgmr.msra.gmra.mrb[0].mxu0 %vm61_vm0, %v40_v13 }
 0x103   :  { %v131_v21 = vpop.f32.mrb[0].mxu0 }
 0x104   :  { %v132_v22 = vadd.f32 %v131_v21, %v54_v19  ;;  %v133_v23 = vpop.f32.mrb[1].mxu0 }
 0x105   :  { %v134_v24 = vadd.f32 %v133_v23, %v58_v20 }
 0x107   :  { %v138_v25 = vcombine.low %v132_v22, %v134_v24 }
 0x109   :  { %155 = vst.sshfl [vmem:[%s282_s3] sm:$0x33 pattern:$0x76325410] %v138_v25 }
 0x10a   :  { %152 = vsyncpa [#allocation3], 1 }
 0x10b   :  { %153 = vsyncpa [#allocation5], 1 }

</bundles_post_ra>
